<compile_context>
chip_gen: v6e
topology: v6e:2x2x1
jax: 0.10.0
libtpu: 0.0.40
codegen_flags: <defaults>
</compile_context>

<pallas_src>
import jax
import jax.numpy as jnp
from jax.experimental import pallas as pl
from jax.experimental.pallas import tpu as pltpu

D_EMB = 100
HEAD_SIZE = 20
NUM_HEADS = 6
D_PAD = 128            # lane-dense embedding dim inside the kernel
GROUP = 128            # lane-aligned width of each of the Q / K / V column groups
QKV_COLS = 3 * GROUP   # 384


def _mha_kernel(x_ref, wqkv_ref, wproj_ref, bp_ref, o_ref):
    """One grid step = one block of Bb batch elements; all heads handled in-body."""
    Bb, T, Dp = x_ref.shape
    N = Bb * T
    H, hs = NUM_HEADS, HEAD_SIZE

    # ---- fused QKV projection: one bf16 MXU matmul over all batch rows ----
    xf = x_ref[...].reshape(N, Dp)                                  # (N, 128) bf16
    qkv = jnp.dot(xf, wqkv_ref[...],
                  preferred_element_type=jnp.float32)               # (N, 384) f32
    qkv3 = qkv.reshape(Bb, T, QKV_COLS)

    # ---- gather per-head q / k / v into a single (H*Bb, T, hs) batch ----
    # Column layout: [Q_h0..Q_h5 pad | K_h0..K_h5 pad | V_h0..V_h5 pad]; every
    # per-head slice stays inside a single 128-lane vreg tile.
    def gather(group):
        base = group * GROUP
        return jnp.stack(
            [qkv3[:, :, base + h * hs: base + (h + 1) * hs] for h in range(H)],
            axis=0,
        ).reshape(H * Bb, T, hs)                                    # n = h*Bb + b

    q = gather(0)   # 1/sqrt(hs) already folded into the Q weight columns
    k = gather(1)
    v = gather(2)

    # ---- scores + softmax, batched over all (head, batch) pairs at once ----
    s = jnp.einsum("nqe,nke->nqk", q, k,
                   preferred_element_type=jnp.float32)              # (H*Bb, T, T)
    s = s - jnp.max(s, axis=-1, keepdims=True)
    p = jnp.exp(s)
    wei = p * pl.reciprocal(jnp.sum(p, axis=-1, keepdims=True), approx=True)

    # ---- attention output (bf16 MXU operands, f32 accumulate) ----
    attn = jnp.einsum("nqk,nke->nqe",
                      wei.astype(jnp.bfloat16), v.astype(jnp.bfloat16),
                      preferred_element_type=jnp.float32)           # (H*Bb, T, hs)

    # ---- output projection: per-head accumulation into an f32 register acc ----
    wp = wproj_ref[...]                                             # (H, hs, 128) bf16
    acc = jnp.zeros((N, Dp), jnp.float32)
    for h in range(H):   # static unroll, no VMEM round trip / masked stores
        a_h = attn[h * Bb:(h + 1) * Bb].reshape(N, hs).astype(jnp.bfloat16)
        acc = acc + jnp.dot(a_h, wp[h], preferred_element_type=jnp.float32)

    o_ref[...] = (acc + bp_ref[...]).reshape(Bb, T, Dp)


def multi_head_attention(x, wq, wk, wv, wp, bp):
    """x: (B, T, D) f32; returns (B, T, D) f32."""
    B, T, D = x.shape
    H, _, hs = wq.shape
    assert D == D_EMB and hs == HEAD_SIZE and H == NUM_HEADS

    pad_d = D_PAD - D
    scale = hs ** (-0.5)

    # --- one-time weight fusion / layout (would be precomputed in a real model) ---
    def make_group(w, s=1.0):
        g = (w * s).transpose(1, 0, 2).reshape(D, H * hs)        # (D, 120) head-major
        return jnp.pad(g, ((0, pad_d), (0, GROUP - H * hs)))     # (128, 128)

    w_qkv = jnp.concatenate(
        [make_group(wq, scale), make_group(wk), make_group(wv)], axis=1
    ).astype(jnp.bfloat16)                                       # (128, 384) bf16
    w_proj = jnp.pad(wp, ((0, 0), (0, 0), (0, pad_d))).astype(jnp.bfloat16)  # (H,hs,128)
    bias = jnp.pad(bp, ((0, 0), (0, pad_d))).astype(jnp.float32)             # (1, 128)

    x_p = jnp.pad(x, ((0, 0), (0, 0), (0, pad_d))).astype(jnp.bfloat16)      # (B,T,128)

    # --- batch-block size: fill the MXU M dim, but keep >= 2 grid steps (v7x) ---
    target_rows = 256
    bb = max(1, min(B, target_rows // max(T, 1)))
    while B % bb:
        bb -= 1
    if B // bb < 2 and B >= 2:
        bb = max(d for d in range(1, B) if B % d == 0)
    grid_b = B // bb

    out_p = pl.pallas_call(
        _mha_kernel,
        out_shape=jax.ShapeDtypeStruct((B, T, D_PAD), jnp.float32),
        grid_spec=pltpu.PrefetchScalarGridSpec(
            num_scalar_prefetch=0,
            grid=(grid_b,),
            in_specs=[
                pl.BlockSpec((bb, T, D_PAD), lambda b: (b, 0, 0)),      # x block
                pl.BlockSpec((D_PAD, QKV_COLS), lambda b: (0, 0)),      # fused Wqkv
                pl.BlockSpec((H, hs, D_PAD), lambda b: (0, 0, 0)),      # Wproj (per head)
                pl.BlockSpec((1, D_PAD), lambda b: (0, 0)),             # proj bias
            ],
            out_specs=pl.BlockSpec((bb, T, D_PAD), lambda b: (b, 0, 0)),
        ),
        compiler_params=pltpu.CompilerParams(
            dimension_semantics=("parallel",),
        ),
    )(x_p, w_qkv, w_proj, bias)

    return out_p[..., :D]


def _reference(x, wq, wk, wv, wp, bp):
    """Plain-JAX f32 reference matching the PyTorch forward (dropout in eval mode)."""
    q = jnp.einsum("btd,hde->bhte", x, wq)
    k = jnp.einsum("btd,hde->bhte", x, wk)
    v = jnp.einsum("btd,hde->bhte", x, wv)
    wei = jnp.einsum("bhqe,bhke->bhqk", q, k) * (HEAD_SIZE ** -0.5)
    wei = jax.nn.softmax(wei, axis=-1)
    out_h = jnp.einsum("bhqk,bhke->bhqe", wei, v)          # (B, H, T, hs)
    proj = jnp.einsum("bhte,hed->btd", out_h, wp) + bp[0]  # fused concat + Linear
    return proj


if __name__ == "__main__":
    B, T = 2, 8
    key = jax.random.PRNGKey(0)
    kx, kq, kk, kv, kp, kb = jax.random.split(key, 6)

    x = jax.random.normal(kx, (B, T, D_EMB), dtype=jnp.float32)
    wq = jax.random.normal(kq, (NUM_HEADS, D_EMB, HEAD_SIZE), dtype=jnp.float32) * 0.05
    wk = jax.random.normal(kk, (NUM_HEADS, D_EMB, HEAD_SIZE), dtype=jnp.float32) * 0.05
    wv = jax.random.normal(kv, (NUM_HEADS, D_EMB, HEAD_SIZE), dtype=jnp.float32) * 0.05
    wp = jax.random.normal(kp, (NUM_HEADS, HEAD_SIZE, D_EMB), dtype=jnp.float32) * 0.05
    bp = jax.random.normal(kb, (1, D_EMB), dtype=jnp.float32) * 0.05

    out = multi_head_attention(x, wq, wk, wv, wp, bp)
    out = jax.block_until_ready(out)

    ref = _reference(x, wq, wk, wv, wp, bp)
    assert out.shape == (B, T, D_EMB)
    # Tolerance accounts for bf16 matmul operands (f32 accumulation / f32 softmax)
    # and the hardware-approximate softmax reciprocal, per the perf review.
    assert jnp.allclose(out, ref, atol=3e-2, rtol=3e-2), "mismatch vs reference"

    print("KERNEL_OK")
</pallas_src>

<mosaic_0001>
module attributes {stable_mosaic.version = 11 : i64} {
  func.func @_mha_kernel(%arg0: i32, %arg1: memref<1x8x128xbf16, #tpu.memory_space<vmem>>, %arg2: memref<128x384xbf16, #tpu.memory_space<vmem>>, %arg3: memref<6x20x128xbf16, #tpu.memory_space<vmem>>, %arg4: memref<1x128xf32, #tpu.memory_space<vmem>>, %arg5: memref<1x8x128xf32, #tpu.memory_space<vmem>>) attributes {dimension_semantics = [#tpu.dimension_semantics<parallel>], iteration_bounds = array<i64: 2>, scalar_prefetch = 0 : i64, scratch_operands = 0 : i64, tpu.core_type = #tpu.core_type<tc>, window_params = [{transform_indices = @transform_0, window_bounds = array<i64: 1, 8, 128>}, {pipeline_mode = #tpu.pipeline_mode<synchronous>, transform_indices = @transform_1, window_bounds = array<i64: 128, 384>}, {pipeline_mode = #tpu.pipeline_mode<synchronous>, transform_indices = @transform_2, window_bounds = array<i64: 6, 20, 128>}, {pipeline_mode = #tpu.pipeline_mode<synchronous>, transform_indices = @transform_3, window_bounds = array<i64: 1, 128>}, {transform_indices = @transform_4, window_bounds = array<i64: 1, 8, 128>}]} {
    %c0 = arith.constant 0 : index
    %c0_0 = arith.constant 0 : index
    %c0_1 = arith.constant 0 : index
    %0 = vector.load %arg1[%c0, %c0_0, %c0_1] : memref<1x8x128xbf16, #tpu.memory_space<vmem>>, vector<1x8x128xbf16>
    %1 = vector.shape_cast %0 : vector<1x8x128xbf16> to vector<8x128xbf16>
    %c0_2 = arith.constant 0 : index
    %c0_3 = arith.constant 0 : index
    %2 = vector.load %arg2[%c0_2, %c0_3] : memref<128x384xbf16, #tpu.memory_space<vmem>>, vector<128x384xbf16>
    %cst = arith.constant dense<0.000000e+00> : vector<8x384xf32>
    %3 = tpu.matmul %1, %2, %cst {dimension_numbers = #tpu.dot_dimension_numbers<[1], [0], [0], [1], [0, 0, 1, 1], [], []>} : vector<8x128xbf16>, vector<128x384xbf16>, vector<8x384xf32> -> vector<8x384xf32>
    %4 = vector.shape_cast %3 : vector<8x384xf32> to vector<1x8x384xf32>
    %5 = vector.extract_strided_slice %4 {offsets = [0, 0, 0], sizes = [1, 8, 20], strides = [1, 1, 1]} : vector<1x8x384xf32> to vector<1x8x20xf32>
    %6 = vector.extract_strided_slice %4 {offsets = [0, 0, 20], sizes = [1, 8, 20], strides = [1, 1, 1]} : vector<1x8x384xf32> to vector<1x8x20xf32>
    %7 = vector.extract_strided_slice %4 {offsets = [0, 0, 40], sizes = [1, 8, 20], strides = [1, 1, 1]} : vector<1x8x384xf32> to vector<1x8x20xf32>
    %8 = vector.extract_strided_slice %4 {offsets = [0, 0, 60], sizes = [1, 8, 20], strides = [1, 1, 1]} : vector<1x8x384xf32> to vector<1x8x20xf32>
    %9 = vector.extract_strided_slice %4 {offsets = [0, 0, 80], sizes = [1, 8, 20], strides = [1, 1, 1]} : vector<1x8x384xf32> to vector<1x8x20xf32>
    %10 = vector.extract_strided_slice %4 {offsets = [0, 0, 100], sizes = [1, 8, 20], strides = [1, 1, 1]} : vector<1x8x384xf32> to vector<1x8x20xf32>
    %11 = vector.shape_cast %5 : vector<1x8x20xf32> to vector<1x1x8x20xf32>
    %12 = vector.shape_cast %6 : vector<1x8x20xf32> to vector<1x1x8x20xf32>
    %13 = vector.shape_cast %7 : vector<1x8x20xf32> to vector<1x1x8x20xf32>
    %14 = vector.shape_cast %8 : vector<1x8x20xf32> to vector<1x1x8x20xf32>
    %15 = vector.shape_cast %9 : vector<1x8x20xf32> to vector<1x1x8x20xf32>
    %16 = vector.shape_cast %10 : vector<1x8x20xf32> to vector<1x1x8x20xf32>
    %17 = tpu.concatenate %11, %12, %13, %14, %15, %16 in 0 : vector<1x1x8x20xf32>, vector<1x1x8x20xf32>, vector<1x1x8x20xf32>, vector<1x1x8x20xf32>, vector<1x1x8x20xf32>, vector<1x1x8x20xf32> -> vector<6x1x8x20xf32>
    %18 = vector.shape_cast %17 : vector<6x1x8x20xf32> to vector<6x8x20xf32>
    %19 = vector.extract_strided_slice %4 {offsets = [0, 0, 128], sizes = [1, 8, 20], strides = [1, 1, 1]} : vector<1x8x384xf32> to vector<1x8x20xf32>
    %20 = vector.extract_strided_slice %4 {offsets = [0, 0, 148], sizes = [1, 8, 20], strides = [1, 1, 1]} : vector<1x8x384xf32> to vector<1x8x20xf32>
    %21 = vector.extract_strided_slice %4 {offsets = [0, 0, 168], sizes = [1, 8, 20], strides = [1, 1, 1]} : vector<1x8x384xf32> to vector<1x8x20xf32>
    %22 = vector.extract_strided_slice %4 {offsets = [0, 0, 188], sizes = [1, 8, 20], strides = [1, 1, 1]} : vector<1x8x384xf32> to vector<1x8x20xf32>
    %23 = vector.extract_strided_slice %4 {offsets = [0, 0, 208], sizes = [1, 8, 20], strides = [1, 1, 1]} : vector<1x8x384xf32> to vector<1x8x20xf32>
    %24 = vector.extract_strided_slice %4 {offsets = [0, 0, 228], sizes = [1, 8, 20], strides = [1, 1, 1]} : vector<1x8x384xf32> to vector<1x8x20xf32>
    %25 = vector.shape_cast %19 : vector<1x8x20xf32> to vector<1x1x8x20xf32>
    %26 = vector.shape_cast %20 : vector<1x8x20xf32> to vector<1x1x8x20xf32>
    %27 = vector.shape_cast %21 : vector<1x8x20xf32> to vector<1x1x8x20xf32>
    %28 = vector.shape_cast %22 : vector<1x8x20xf32> to vector<1x1x8x20xf32>
    %29 = vector.shape_cast %23 : vector<1x8x20xf32> to vector<1x1x8x20xf32>
    %30 = vector.shape_cast %24 : vector<1x8x20xf32> to vector<1x1x8x20xf32>
    %31 = tpu.concatenate %25, %26, %27, %28, %29, %30 in 0 : vector<1x1x8x20xf32>, vector<1x1x8x20xf32>, vector<1x1x8x20xf32>, vector<1x1x8x20xf32>, vector<1x1x8x20xf32>, vector<1x1x8x20xf32> -> vector<6x1x8x20xf32>
    %32 = vector.shape_cast %31 : vector<6x1x8x20xf32> to vector<6x8x20xf32>
    %33 = vector.extract_strided_slice %4 {offsets = [0, 0, 256], sizes = [1, 8, 20], strides = [1, 1, 1]} : vector<1x8x384xf32> to vector<1x8x20xf32>
    %34 = vector.extract_strided_slice %4 {offsets = [0, 0, 276], sizes = [1, 8, 20], strides = [1, 1, 1]} : vector<1x8x384xf32> to vector<1x8x20xf32>
    %35 = vector.extract_strided_slice %4 {offsets = [0, 0, 296], sizes = [1, 8, 20], strides = [1, 1, 1]} : vector<1x8x384xf32> to vector<1x8x20xf32>
    %36 = vector.extract_strided_slice %4 {offsets = [0, 0, 316], sizes = [1, 8, 20], strides = [1, 1, 1]} : vector<1x8x384xf32> to vector<1x8x20xf32>
    %37 = vector.extract_strided_slice %4 {offsets = [0, 0, 336], sizes = [1, 8, 20], strides = [1, 1, 1]} : vector<1x8x384xf32> to vector<1x8x20xf32>
    %38 = vector.extract_strided_slice %4 {offsets = [0, 0, 356], sizes = [1, 8, 20], strides = [1, 1, 1]} : vector<1x8x384xf32> to vector<1x8x20xf32>
    %39 = vector.shape_cast %33 : vector<1x8x20xf32> to vector<1x1x8x20xf32>
    %40 = vector.shape_cast %34 : vector<1x8x20xf32> to vector<1x1x8x20xf32>
    %41 = vector.shape_cast %35 : vector<1x8x20xf32> to vector<1x1x8x20xf32>
    %42 = vector.shape_cast %36 : vector<1x8x20xf32> to vector<1x1x8x20xf32>
    %43 = vector.shape_cast %37 : vector<1x8x20xf32> to vector<1x1x8x20xf32>
    %44 = vector.shape_cast %38 : vector<1x8x20xf32> to vector<1x1x8x20xf32>
    %45 = tpu.concatenate %39, %40, %41, %42, %43, %44 in 0 : vector<1x1x8x20xf32>, vector<1x1x8x20xf32>, vector<1x1x8x20xf32>, vector<1x1x8x20xf32>, vector<1x1x8x20xf32>, vector<1x1x8x20xf32> -> vector<6x1x8x20xf32>
    %46 = vector.shape_cast %45 : vector<6x1x8x20xf32> to vector<6x8x20xf32>
    "tpu.trace_start"() <{level = 10 : i32, message = "nqe,nke->nqk"}> : () -> ()
    %cst_4 = arith.constant dense<0.000000e+00> : vector<6x8x8xf32>
    %47 = tpu.matmul %18, %32, %cst_4 {dimension_numbers = #tpu.dot_dimension_numbers<[2], [2], [1], [1], [0, 0, 0, 1, 1, 1], [0], [0]>} : vector<6x8x20xf32>, vector<6x8x20xf32>, vector<6x8x8xf32> -> vector<6x8x8xf32>
    "tpu.trace_stop"() : () -> ()
    %cst_5 = arith.constant dense<0xFF800000> : vector<6x8xf32>
    %48 = vector.multi_reduction <maximumf>, %47, %cst_5 [2] : vector<6x8x8xf32> to vector<6x8xf32>
    %49 = vector.shape_cast %48 : vector<6x8xf32> to vector<6x8x1xf32>
    %50 = vector.broadcast %49 : vector<6x8x1xf32> to vector<6x8x8xf32>
    %51 = arith.subf %47, %50 : vector<6x8x8xf32>
    %52 = math.exp %51 : vector<6x8x8xf32>
    %cst_6 = arith.constant dense<0.000000e+00> : vector<6x8xf32>
    %53 = vector.multi_reduction <add>, %52, %cst_6 [2] : vector<6x8x8xf32> to vector<6x8xf32>
    %54 = vector.shape_cast %53 : vector<6x8xf32> to vector<6x8x1xf32>
    %55 = tpu.reciprocal %54 {approx = true} : vector<6x8x1xf32> -> vector<6x8x1xf32>
    %56 = vector.broadcast %55 : vector<6x8x1xf32> to vector<6x8x8xf32>
    %57 = arith.mulf %52, %56 : vector<6x8x8xf32>
    %58 = arith.truncf %57 : vector<6x8x8xf32> to vector<6x8x8xbf16>
    %59 = arith.truncf %46 : vector<6x8x20xf32> to vector<6x8x20xbf16>
    "tpu.trace_start"() <{level = 10 : i32, message = "nqk,nke->nqe"}> : () -> ()
    %cst_7 = arith.constant dense<0.000000e+00> : vector<6x8x20xf32>
    %60 = tpu.matmul %58, %59, %cst_7 {dimension_numbers = #tpu.dot_dimension_numbers<[2], [1], [1], [2], [0, 0, 0, 1, 1, 2], [0], [0]>} : vector<6x8x8xbf16>, vector<6x8x20xbf16>, vector<6x8x20xf32> -> vector<6x8x20xf32>
    "tpu.trace_stop"() : () -> ()
    %c0_8 = arith.constant 0 : index
    %c0_9 = arith.constant 0 : index
    %c0_10 = arith.constant 0 : index
    %61 = vector.load %arg3[%c0_8, %c0_9, %c0_10] : memref<6x20x128xbf16, #tpu.memory_space<vmem>>, vector<6x20x128xbf16>
    %cst_11 = arith.constant 0.000000e+00 : f32
    %62 = vector.broadcast %cst_11 : f32 to vector<8x128xf32>
    %63 = vector.extract_strided_slice %60 {offsets = [0, 0, 0], sizes = [1, 8, 20], strides = [1, 1, 1]} : vector<6x8x20xf32> to vector<1x8x20xf32>
    %64 = vector.shape_cast %63 : vector<1x8x20xf32> to vector<8x20xf32>
    %65 = arith.truncf %64 : vector<8x20xf32> to vector<8x20xbf16>
    %66 = vector.extract_strided_slice %61 {offsets = [0, 0, 0], sizes = [1, 20, 128], strides = [1, 1, 1]} : vector<6x20x128xbf16> to vector<1x20x128xbf16>
    %67 = vector.shape_cast %66 : vector<1x20x128xbf16> to vector<20x128xbf16>
    %cst_12 = arith.constant dense<0.000000e+00> : vector<8x128xf32>
    %68 = tpu.matmul %65, %67, %cst_12 {dimension_numbers = #tpu.dot_dimension_numbers<[1], [0], [0], [1], [0, 0, 1, 1], [], []>} : vector<8x20xbf16>, vector<20x128xbf16>, vector<8x128xf32> -> vector<8x128xf32>
    %69 = arith.addf %62, %68 : vector<8x128xf32>
    %70 = vector.extract_strided_slice %60 {offsets = [1, 0, 0], sizes = [1, 8, 20], strides = [1, 1, 1]} : vector<6x8x20xf32> to vector<1x8x20xf32>
    %71 = vector.shape_cast %70 : vector<1x8x20xf32> to vector<8x20xf32>
    %72 = arith.truncf %71 : vector<8x20xf32> to vector<8x20xbf16>
    %73 = vector.extract_strided_slice %61 {offsets = [1, 0, 0], sizes = [1, 20, 128], strides = [1, 1, 1]} : vector<6x20x128xbf16> to vector<1x20x128xbf16>
    %74 = vector.shape_cast %73 : vector<1x20x128xbf16> to vector<20x128xbf16>
    %cst_13 = arith.constant dense<0.000000e+00> : vector<8x128xf32>
    %75 = tpu.matmul %72, %74, %cst_13 {dimension_numbers = #tpu.dot_dimension_numbers<[1], [0], [0], [1], [0, 0, 1, 1], [], []>} : vector<8x20xbf16>, vector<20x128xbf16>, vector<8x128xf32> -> vector<8x128xf32>
    %76 = arith.addf %69, %75 : vector<8x128xf32>
    %77 = vector.extract_strided_slice %60 {offsets = [2, 0, 0], sizes = [1, 8, 20], strides = [1, 1, 1]} : vector<6x8x20xf32> to vector<1x8x20xf32>
    %78 = vector.shape_cast %77 : vector<1x8x20xf32> to vector<8x20xf32>
    %79 = arith.truncf %78 : vector<8x20xf32> to vector<8x20xbf16>
    %80 = vector.extract_strided_slice %61 {offsets = [2, 0, 0], sizes = [1, 20, 128], strides = [1, 1, 1]} : vector<6x20x128xbf16> to vector<1x20x128xbf16>
    %81 = vector.shape_cast %80 : vector<1x20x128xbf16> to vector<20x128xbf16>
    %cst_14 = arith.constant dense<0.000000e+00> : vector<8x128xf32>
    %82 = tpu.matmul %79, %81, %cst_14 {dimension_numbers = #tpu.dot_dimension_numbers<[1], [0], [0], [1], [0, 0, 1, 1], [], []>} : vector<8x20xbf16>, vector<20x128xbf16>, vector<8x128xf32> -> vector<8x128xf32>
    %83 = arith.addf %76, %82 : vector<8x128xf32>
    %84 = vector.extract_strided_slice %60 {offsets = [3, 0, 0], sizes = [1, 8, 20], strides = [1, 1, 1]} : vector<6x8x20xf32> to vector<1x8x20xf32>
    %85 = vector.shape_cast %84 : vector<1x8x20xf32> to vector<8x20xf32>
    %86 = arith.truncf %85 : vector<8x20xf32> to vector<8x20xbf16>
    %87 = vector.extract_strided_slice %61 {offsets = [3, 0, 0], sizes = [1, 20, 128], strides = [1, 1, 1]} : vector<6x20x128xbf16> to vector<1x20x128xbf16>
    %88 = vector.shape_cast %87 : vector<1x20x128xbf16> to vector<20x128xbf16>
    %cst_15 = arith.constant dense<0.000000e+00> : vector<8x128xf32>
    %89 = tpu.matmul %86, %88, %cst_15 {dimension_numbers = #tpu.dot_dimension_numbers<[1], [0], [0], [1], [0, 0, 1, 1], [], []>} : vector<8x20xbf16>, vector<20x128xbf16>, vector<8x128xf32> -> vector<8x128xf32>
    %90 = arith.addf %83, %89 : vector<8x128xf32>
    %91 = vector.extract_strided_slice %60 {offsets = [4, 0, 0], sizes = [1, 8, 20], strides = [1, 1, 1]} : vector<6x8x20xf32> to vector<1x8x20xf32>
    %92 = vector.shape_cast %91 : vector<1x8x20xf32> to vector<8x20xf32>
    %93 = arith.truncf %92 : vector<8x20xf32> to vector<8x20xbf16>
    %94 = vector.extract_strided_slice %61 {offsets = [4, 0, 0], sizes = [1, 20, 128], strides = [1, 1, 1]} : vector<6x20x128xbf16> to vector<1x20x128xbf16>
    %95 = vector.shape_cast %94 : vector<1x20x128xbf16> to vector<20x128xbf16>
    %cst_16 = arith.constant dense<0.000000e+00> : vector<8x128xf32>
    %96 = tpu.matmul %93, %95, %cst_16 {dimension_numbers = #tpu.dot_dimension_numbers<[1], [0], [0], [1], [0, 0, 1, 1], [], []>} : vector<8x20xbf16>, vector<20x128xbf16>, vector<8x128xf32> -> vector<8x128xf32>
    %97 = arith.addf %90, %96 : vector<8x128xf32>
    %98 = vector.extract_strided_slice %60 {offsets = [5, 0, 0], sizes = [1, 8, 20], strides = [1, 1, 1]} : vector<6x8x20xf32> to vector<1x8x20xf32>
    %99 = vector.shape_cast %98 : vector<1x8x20xf32> to vector<8x20xf32>
    %100 = arith.truncf %99 : vector<8x20xf32> to vector<8x20xbf16>
    %101 = vector.extract_strided_slice %61 {offsets = [5, 0, 0], sizes = [1, 20, 128], strides = [1, 1, 1]} : vector<6x20x128xbf16> to vector<1x20x128xbf16>
    %102 = vector.shape_cast %101 : vector<1x20x128xbf16> to vector<20x128xbf16>
    %cst_17 = arith.constant dense<0.000000e+00> : vector<8x128xf32>
    %103 = tpu.matmul %100, %102, %cst_17 {dimension_numbers = #tpu.dot_dimension_numbers<[1], [0], [0], [1], [0, 0, 1, 1], [], []>} : vector<8x20xbf16>, vector<20x128xbf16>, vector<8x128xf32> -> vector<8x128xf32>
    %104 = arith.addf %97, %103 : vector<8x128xf32>
    %c0_18 = arith.constant 0 : index
    %c0_19 = arith.constant 0 : index
    %105 = vector.load %arg4[%c0_18, %c0_19] : memref<1x128xf32, #tpu.memory_space<vmem>>, vector<1x128xf32>
    %106 = vector.broadcast %105 : vector<1x128xf32> to vector<8x128xf32>
    %107 = arith.addf %104, %106 : vector<8x128xf32>
    %108 = vector.shape_cast %107 : vector<8x128xf32> to vector<1x8x128xf32>
    %c0_20 = arith.constant 0 : index
    %c0_21 = arith.constant 0 : index
    %c0_22 = arith.constant 0 : index
    %109 = vector.load %arg5[%c0_20, %c0_21, %c0_22] : memref<1x8x128xf32, #tpu.memory_space<vmem>>, vector<1x8x128xf32>
    tpu.vector_store %arg5[%c0_20, %c0_21, %c0_22], %108 {strides = array<i32>} : memref<1x8x128xf32, #tpu.memory_space<vmem>>, vector<1x8x128xf32>,
    return
  }
  func.func @transform_0(%arg0: i32) -> (i32, i32, i32) {
    %c0_i32 = arith.constant 0 : i32
    %c0_i32_0 = arith.constant 0 : i32
    %c0_i32_1 = arith.constant 0 : i32
    return %arg0, %c0_i32, %c0_i32_0 : i32, i32, i32
  }
  func.func @transform_1(%arg0: i32) -> (i32, i32) {
    %c0_i32 = arith.constant 0 : i32
    %c0_i32_0 = arith.constant 0 : i32
    %c0_i32_1 = arith.constant 0 : i32
    return %c0_i32, %c0_i32_0 : i32, i32
  }
  func.func @transform_2(%arg0: i32) -> (i32, i32, i32) {
    %c0_i32 = arith.constant 0 : i32
    %c0_i32_0 = arith.constant 0 : i32
    %c0_i32_1 = arith.constant 0 : i32
    %c0_i32_2 = arith.constant 0 : i32
    return %c0_i32, %c0_i32_0, %c0_i32_1 : i32, i32, i32
  }
  func.func @transform_3(%arg0: i32) -> (i32, i32) {
    %c0_i32 = arith.constant 0 : i32
    %c0_i32_0 = arith.constant 0 : i32
    %c0_i32_1 = arith.constant 0 : i32
    return %c0_i32, %c0_i32_0 : i32, i32
  }
  func.func @transform_4(%arg0: i32) -> (i32, i32, i32) {
    %c0_i32 = arith.constant 0 : i32
    %c0_i32_0 = arith.constant 0 : i32
    %c0_i32_1 = arith.constant 0 : i32
    return %arg0, %c0_i32, %c0_i32_0 : i32, i32, i32
  }
}

</mosaic_0001>

<bundles_post_ra>
// kernel: tpu_custom_call.1
= control target key start
LH: loop header
LB: loop body
LE: loop exit
PB: predicated region body
PF: predicated region fallthrough
CT: control target
= control target key end

     0   :  { %9 = vsyncpa [#allocation3], 0  ;;  %s2725_s0 = inlined_call_operand.hbm [shape: bf16[2,8,128], index: 0, kind: input, shape index: {}]   ;;  %s2726_s1 = inlined_call_operand.hbm [shape: bf16[128,384], index: 1, kind: input, shape index: {}]   ;;  %s2727_s2 = inlined_call_operand.hbm [shape: bf16[6,20,128], index: 2, kind: input, shape index: {}]   ;;  %s2728_s3 = inlined_call_operand.vmem [shape: f32[1,128], index: 3, kind: input, shape index: {}]   ;;  %s2729_s4 = inlined_call_operand.hbm [shape: f32[2,8,128], index: 4, kind: output, shape index: {}]  }
   0x1   :  { %11 = vsyncpa [#allocation3 + $0x1], 0 }
   0x2   :  { %12 = vsyncpa [#allocation6], 0 }
   0x3   :  { %13 = vsyncpa [#allocation4], 0 }
   0x4   :  { %15 = vsyncpa [#allocation4 + $0x1], 0  ;;  %s2395_s15 = smov 0   ;;  %s2397_s16 = smov 0  }
   0x5   :  { %s2399_s17 = smov 0   ;;  %s2401_s18 = smov 0  }
   0x6 LB: > { %s2416_s19 = sadd.s32 4294967295, %s2352_s18   ;;  %s1795_s20 = sadd.s32 4294967294, %s2352_s18   ;;  %s2352_s18 = sphi %s2401_s18, %s2751_s18   ;;  %s2348_s17 = sphi %s2399_s17, %s2750_s17   ;;  %s2344_s16 = sphi %s2397_s16, %s2749_s16   ;;  %s2340_s15 = sphi %s2395_s15, %s2748_s15  }
   0x7   : > { %p41_p0 = scmp.ne.s32.totalorder %s2344_s16, %s2340_s15  ;;  %p2730_p1 = scmp.eq.s32.totalorder %s2416_s19, 0 }
   0x8   : > { %p134_p3 = scmp.eq.s32.totalorder %s1795_s20, 1  ;;  %p1796_p5 = scmp.ge.s32.totalorder %s2352_s18, 1 }
   0x9   : > { %p2425_p4 = por %p2730_p1, %p41_p0  ;;  %p141_p7 = scmp.lt.s32.totalorder %s2352_s18, 3 }
   0xa   : > { %p2430_p6 = por %p134_p3, %p41_p0  ;;  %s2354_s24 = smov [#allocation5]  }
   0xb   : > { %s2734_s21 = scalar_select %p2425_p4, 1, 0 }
   0xc   : > { %s2735_s22 = scalar_select %p2430_p6, 1, 0 }
   0xd   : > { %p2435_p8 = pnand %p1796_p5, %p141_p7  ;;  %s153_s25 = sshll.u32 %s2354_s24, 4  ;;  %s154_s25 = int_to_ptr.vmem [resolvable:$true] %s153_s25 }
   0xe   : > { %s2355_s27 = smov [#allocation7]   ;;  %s2215_s29 = scalar_lea.vmem %s154_s25, 3072 }
   0xf   : > { %s2736_s23 = scalar_select %p2435_p8, 1, 0 }
  0x10   : > { %p2069_p9 = pneg %p2435_p8  ;;  %s166_s28 = sshll.u32 %s2355_s27, 4  ;;  %s167_s28 = int_to_ptr.vmem [resolvable:$true] %s166_s28 }
  0x11   : > { %p2216_p13 = scmp.ne.s32.totalorder %s154_s25, %s2215_s29  ;;  %p2223_p5 = scmp.lt.s32.totalorder %s154_s25, %s154_s25 }
  0x12   : > { %p2444_p11 = pnand %p2069_p9, %p2730_p1  ;;  %p2224_p7 = scmp.lt.s32.totalorder %s2215_s29, %s2215_s29 }
  0x14   : > { %p2206_p12 = pneg %p2444_p11  ;;  %p2225_p10 = por %p2224_p7, %p2223_p5 }
  0x16   : > { %p2218_p0 = pnand %p2216_p13, %p2206_p12 }
  0x18   : > { %p2219_p3 = pneg %p2218_p0 }
  0x1a   : > { %p2226_p9 = pnand %p2225_p10, %p2219_p3 }
  0x1c   : > { %2229 = shalt.err (!%p2226_p9)
}
  0x1d   : > { %s2356_s30 = smov 192   ;;  %s2357_s5 = smov 12  }
  0x1e   : > { %2072 = dma.hbm_to_vmem [thread:$0]  (!%p2444_p11), %s2726_s1, 3072, %s154_s25, [#allocation6], %s2356_s30, %s2356_s30, %s2357_s5  }
  0x1f   : > { %s2241_s8 = scalar_lea.vmem %s167_s28, 1152  ;;  %p2249_p2 = scmp.lt.s32.totalorder %s167_s28, %s167_s28 }
  0x20   : > { %p2242_p1 = scmp.ne.s32.totalorder %s167_s28, %s2241_s8  ;;  %p2250_p6 = scmp.lt.s32.totalorder %s2241_s8, %s2241_s8 }
  0x22   : > { %p2244_p13 = pnand %p2242_p1, %p2206_p12  ;;  %p2251_p5 = por %p2250_p6, %p2249_p2 }
  0x24   : > { %p2245_p0 = pneg %p2244_p13 }
  0x26   : > { %p2252_p10 = pnand %p2251_p5, %p2245_p0 }
  0x28   : > { %2255 = shalt.err (!%p2252_p10)
}
  0x29   : > { %s2358_s9 = smov 64   ;;  %s2359_s10 = smov 4  }
  0x2a   : > { %2075 = dma.hbm_to_vmem [thread:$0]  (!%p2444_p11), %s2727_s2, 1152, %s167_s28, [#allocation6], %s2358_s9, %s2358_s9, %s2359_s10  }
  0x2b   : > { %s2467_s13 = sadd.s32 1, %s2352_s18   ;;  %s28_s20 = sadd.s32 1, %s2348_s17 }
  0x2c   : > { %s25_s14 = ssub.s32 %s2352_s18, %s2467_s13  ;;  %p35_p2 = scmp.ne.s32.totalorder %s2348_s17, %s2344_s16 }
  0x2d   : > { %p26_p1 = scmp.eq.s32.totalorder %s25_s14, 0  ;;  %p36_p6 = scmp.eq.s32.totalorder %s2352_s18, 0 }
  0x2e   : > { %p2738_p3 = scmp.eq.s32.totalorder %s2416_s19, 1  ;;  %p2086_p9 = scmp.lt.s32.totalorder %s2352_s18, 2 }
  0x2f   : > { %s2476_s24 = scalar_select %p26_p1, %s2348_s17, %s28_s20  }
  0x30   : > { %p37_p12 = por %p36_p6, %p35_p2  ;;  %p2480_p7 = por %p2738_p3, %p35_p2 }
  0x31   : > { %s183_s26 = sand.u32 1, %s2348_s17   ;;  %s1801_s28 = sshll.u32 %s2352_s18, 6 }
  0x32   : > { %s2739_s25 = scalar_select %p2480_p7, 1, 0 }
  0x33   : > { %s1800_s27 = sshll.u32 %s183_s26, 2  ;;  %s2490_s5 = scalar_lea.hbm %s2725_s0, %s1801_s28 }
  0x34   : > { %s187_s6 = scalar_lea.vmem [#allocation2], %s1800_s27  ;;  %p2492_p11 = pnand %p2086_p9, %p37_p12 }
  0x35   : > { %s194_s7 = sshll.u32 %s187_s6, 4  ;;  %s184_s9 = scalar_lea.sflag [#allocation3], %s183_s26  ;;  %s195_s7 = int_to_ptr.vmem [resolvable:$true] %s194_s7 }
  0x36   : > { %s2256_s10 = scalar_lea.hbm %s2490_s5, 64  ;;  %p2258_p0 = pneg %p2492_p11 }
  0x37   : > { %p2257_p13 = scmp.ne.s32.totalorder %s2490_s5, %s2256_s10  ;;  %s2261_s14 = scalar_lea.hbm %s2725_s0, 128 }
  0x38   : > { %p2262_p1 = scmp.lt.s32.totalorder %s2490_s5, %s2725_s0  ;;  %p2263_p2 = scmp.lt.s32.totalorder %s2261_s14, %s2256_s10 }
  0x39   : > { %p2259_p5 = pnand %p2258_p0, %p2257_p13 }
  0x3a   : > { %p2264_p6 = por %p2263_p2, %p2262_p1 }
  0x3b   : > { %p2260_p10 = pneg %p2259_p5 }
  0x3d   : > { %p2265_p12 = pnand %p2264_p6, %p2260_p10 }
  0x3f   : > { %2268 = shalt.err (!%p2265_p12)
}
  0x40   : > { %s2269_s28 = scalar_lea.vmem %s195_s7, 64  ;;  %s2360_s26 = smov [#allocation2]  }
  0x41   : > { %p2270_p3 = scmp.ne.s32.totalorder %s195_s7, %s2269_s28  ;;  %s2274_s29 = sshll.u32 %s2360_s26, 4  ;;  %s2275_s29 = int_to_ptr.vmem [resolvable:$false] %s2274_s29 }
  0x42   : > { %s2276_s30 = scalar_lea.vmem %s2275_s29, 128  ;;  %p2277_p13 = scmp.lt.s32.totalorder %s195_s7, %s2275_s29 }
  0x43   : > { %p2272_p9 = pnand %p2270_p3, %p2258_p0  ;;  %p2278_p5 = scmp.lt.s32.totalorder %s2276_s30, %s2269_s28 }
  0x45   : > { %p2273_p7 = pneg %p2272_p9  ;;  %p2279_p4 = por %p2278_p5, %p2277_p13 }
  0x47   : > { %p2280_p8 = pnand %p2279_p4, %p2273_p7 }
  0x49   : > { %2283 = shalt.err (!%p2280_p8)
}
  0x4a   : > { %2079 = dma.hbm_to_vmem [thread:$0]  (!%p2492_p11), %s2490_s5, 64, %s195_s7, %s184_s9  }
  0x4b   : > { %p2741_p10 = scmp.ne.s32.totalorder %s2736_s23, 0 }
  0x4c   : > { %s2513_s6 = sand.u32 (!%p2741_p10), 1, %s2344_s16   ;;  %p2742_p0 = scmp.ne.s32.totalorder (!%p2741_p10), %s2734_s21, 0 }
  0x4d   : > { %203 = sbr.rel (%p2741_p10) target bundleno = 1408 (0x580), region = 36  ;;  %s1803_s10 = sshll.u32 (!%p2741_p10), %s2513_s6, 2 }
  0x4e   : > { %s206_s11 = scalar_lea.sflag (!%p2741_p10), [#allocation3], %s2513_s6  ;;  %s2517_s12 = scalar_lea.vmem (!%p2741_p10), [#allocation2], %s1803_s10 }
  0x52   : > { %2327 = dma.done.wait (%p2742_p0), %s206_s11, 64  }
  0x53   : > { %2329 = vsyncadd (%p2742_p0), %s206_s11, 4294967232  ;;  %p2743_p4 = scmp.eq.s32.totalorder %s2416_s19, 0 }
  0x55   : > { %2331 = dma.done.wait (%p2743_p4), [#allocation6], 4224   ;;  %p2744_p8 = pmov %p2743_p4 }
  0x56   : > { %v2361_v0 = vmov 0   ;;  %v2136_v1 = vld [vmem:[#allocation5 + $0xac] ss:$12 sps:$4 sm:$0xff]   ;;  %v2138_v2 = vld [vmem:[#allocation5 + $0xa8] ss:$12 sps:$4 sm:$0xff]   ;;  %v2362_v18 = vmov 0.0  }
  0x57   : > { %2333 = vsyncadd (%p2744_p8), [#allocation6], 4294963072  ;;  %436 = vmatprep.mubr.bf16.mxu0 %v2361_v0  ;;  %404 = vmatprep.subr.bf16.mxu0 %v2136_v1  ;;  %v2139_v3 = vld [vmem:[#allocation5 + $0x94] ss:$12 sps:$4 sm:$0xff]   ;;  %v2141_v4 = vld [vmem:[#allocation5 + $0x90] ss:$12 sps:$4 sm:$0xff]  }
  0x58   : > { %405 = vmatpush1.bf16.msra.mxu0 %v2138_v2  ;;  %v2142_v5 = vld [vmem:[#allocation5 + $0x7c] ss:$12 sps:$4 sm:$0xff]   ;;  %v2144_v6 = vld [vmem:[#allocation5 + $0x78] ss:$12 sps:$4 sm:$0xff]   ;;  %v2147_v8 = vld [vmem:[#allocation5 + $0x60] ss:$12 sps:$4 sm:$0xff]   ;;  %1923 = vmatprep.subr.bf16.mxu1 %v2362_v18 }
  0x59   : > { %406 = vmatprep.subr.bf16.mxu0 %v2139_v3  ;;  %v2145_v7 = vld [vmem:[#allocation5 + $0x64] ss:$12 sps:$4 sm:$0xff]   ;;  %v2148_v9 = vld [vmem:[#allocation5 + $0x4c] ss:$12 sps:$4 sm:$0xff]   ;;  %v2150_v10 = vld [vmem:[#allocation5 + $0x48] ss:$12 sps:$4 sm:$0xff]  }
  0x5a   : > { %v2151_v11 = vld [vmem:[#allocation5 + $0x34] ss:$12 sps:$4 sm:$0xff]   ;;  %v2153_v12 = vld [vmem:[#allocation5 + $0x30] ss:$12 sps:$4 sm:$0xff]   ;;  %v2156_v14 = vld [vmem:[#allocation5 + $0x18] ss:$12 sps:$4 sm:$0xff]  }
  0x5b   : > { %v2154_v13 = vld [vmem:[#allocation5 + $0x1c] ss:$12 sps:$4 sm:$0xff]   ;;  %v2157_v15 = vld [vmem:[#allocation5 + $0x4] ss:$12 sps:$4 sm:$0xff]   ;;  %v2159_v16 = vld [vmem:[#allocation5] ss:$12 sps:$4 sm:$0xff]  }
  0x5c   : > { %407 = vmatpush1.bf16.msra.mxu0 %v2141_v4  ;;  %v243_v17 = vld [vmem:[%s2517_s12] sm:$0xf]  ;;  %vm2363_vm0 = vmmov 0   ;;  %v2162_v21 = vld [vmem:[#allocation5 + $0x80] ss:$12 sps:$4 sm:$0xff]   ;;  %vm523_vm1 = vcmask 162816  }
  0x5d   : > { %408 = vmatprep.subr.bf16.mxu0 %v2142_v5  ;;  %1939 = vmatprep.mubr.msk.bf16.mxu1 %vm2363_vm0, %v2362_v18  ;;  %v2160_v19 = vld [vmem:[#allocation5 + $0xb0] ss:$12 sps:$4 sm:$0xff]   ;;  %v2161_v20 = vld [vmem:[#allocation5 + $0x98] ss:$12 sps:$4 sm:$0xff]   ;;  %v2163_v22 = vld [vmem:[#allocation5 + $0x68] ss:$12 sps:$4 sm:$0xff]  }
  0x5e   : > { %1924 = vmatpush3.bf16.msra.mxu1 %v2160_v19  ;;  %v2164_v23 = vld [vmem:[#allocation5 + $0x50] ss:$12 sps:$4 sm:$0xff]   ;;  %v2165_v24 = vld [vmem:[#allocation5 + $0x38] ss:$12 sps:$4 sm:$0xff]   ;;  %v2166_v25 = vld [vmem:[#allocation5 + $0x20] ss:$12 sps:$4 sm:$0xff]  }
  0x5f   : > { %1925 = vmatprep.subr.bf16.mxu1 %v2362_v18  ;;  %v2167_v26 = vld [vmem:[#allocation5 + $0x8] ss:$12 sps:$4 sm:$0xff]   ;;  %s2364_s21 = smov 88   ;;  %s2365_s23 = smov 108   ;;  %vm1050_vm2 = vcmask 1043456   ;;  %vm968_vm3 = vcmask 64512  }
  0x60   : > { %409 = vmatpush1.bf16.msra.mxu0 %v2144_v6  ;;  %s2366_s5 = smov 68   ;;  %s2367_s7 = smov 28   ;;  %vm1356_vm4 = vcmask 1041408  }
  0x61   : > { %410 = vmatprep.subr.bf16.mxu0 %v2145_v7  ;;  %s2368_s8 = smov 48   ;;  %s1806_s9 = sshll.u32 %s2513_s6, 3 }
  0x62   : > { %1926 = vmatpush3.bf16.msra.mxu1 %v2161_v20  ;;  %s1869_s27 = sshll.u32 %s2416_s19, 7  ;;  %s241_s28 = scalar_lea.vmem [#allocation8], %s1806_s9 }
  0x63   : > { %1927 = vmatprep.subr.bf16.mxu1 %v2362_v18  ;;  %s1706_s26 = sshll.u32 %s241_s28, 4  ;;  %s2682_s10 = scalar_lea.hbm %s2729_s4, %s1869_s27  ;;  %s2684_s26 = int_to_ptr.vmem [resolvable:$true] %s1706_s26 }
  0x64   : > { %411 = vmatpush1.bf16.msra.mxu0 %v2147_v8  ;;  %s1693_s11 = scalar_lea.sflag [#allocation4], %s2513_s6  ;;  %s2284_s19 = scalar_lea.vmem %s2684_s26, 128 }
  0x65   : > { %412 = vmatprep.subr.bf16.mxu0 %v2148_v9  ;;  %p2285_p7 = scmp.ne.s32.totalorder %s2684_s26, %s2284_s19  ;;  %p2745_p11 = scmp.ne.s32.totalorder %s2739_s25, 0 }
  0x66   : > { %1928 = vmatpush3.bf16.msra.mxu1 %v2162_v21  ;;  %s2369_s12 = smov [#allocation8]  }
  0x67   : > { %1929 = vmatprep.subr.bf16.mxu1 %v2362_v18  ;;  %p2286_p1 = pnand %p2285_p7, %p2745_p11 }
  0x68   : > { %413 = vmatpush1.bf16.msra.mxu0 %v2150_v10 }
  0x69   : > { %414 = vmatprep.subr.bf16.mxu0 %v2151_v11  ;;  %p2287_p2 = pneg %p2286_p1 }
  0x6a   : > { %1930 = vmatpush3.bf16.msra.mxu1 %v2163_v22 }
  0x6b   : > { %1931 = vmatprep.subr.bf16.mxu1 %v2362_v18 }
  0x6c   : > { %415 = vmatpush1.bf16.msra.mxu0 %v2153_v12 }
  0x6d   : > { %416 = vmatprep.subr.bf16.mxu0 %v2154_v13 }
  0x6e   : > { %1932 = vmatpush3.bf16.msra.mxu1 %v2164_v23 }
  0x6f   : > { %1933 = vmatprep.subr.bf16.mxu1 %v2362_v18 }
  0x70   : > { %417 = vmatpush1.bf16.msra.mxu0 %v2156_v14 }
  0x71   : > { %418 = vmatprep.subr.bf16.mxu0 %v2157_v15 }
  0x72   : > { %1934 = vmatpush3.bf16.msra.mxu1 %v2165_v24 }
  0x73   : > { %1935 = vmatprep.subr.bf16.mxu1 %v2362_v18 }
  0x74   : > { %419 = vmatpush1.bf16.msra.mxu0 %v2159_v16 }
  0x75   : > { %1943 = vmatprep.subr.mxu0 %v2362_v18 }
  0x76   : > { %1936 = vmatpush3.bf16.msra.mxu1 %v2166_v25 }
  0x77   : > { %437 = vmatmul.mubr.bf16.vlgmr.msra.gmra.mxu0 %v243_v17  ;;  %1937 = vmatprep.subr.bf16.mxu1 %v2362_v18 }
  0x78   : > { %1945 = vmatprep.mubr.msk.f32.mxu0 %vm2363_vm0, %v2362_v18 }
  0x7a   : > { %1938 = vmatpush3.bf16.msra.mxu1 %v2167_v26 }
  0x7b   : > { %1948 = vmatprep.subr.mxu1 %v2362_v18 }
  0x7d   : > { %1940 = vmatmul.mubr.bf16.vlgmr.msra.gmra.mxu1 %v243_v17 }
  0x7e   : > { %1950 = vmatprep.mubr.msk.f32.mxu1 %vm2363_vm0, %v2362_v18 }
 0x137   : > { %v438_v27 = vpop.f32.mrf.mxu0 }
 0x139   : > { %v440_v28 = vpop.f32.mrf.mxu0 }
 0x13a   : > { %499 = vrot.lane.b32.xlu1 %v440_v28, %s2364_s21  ;;  %497 = vrot.lane.b32.xlu0 %v440_v28, %s2365_s23 }
 0x13b   : > { %1944 = vmatpush3.xpose.msk.msra.mxu0 %vm523_vm1, %v440_v28  ;;  %v442_v29 = vpop.f32.mrf.mxu0 }
 0x13c   : > { %1953 = vmatprep.subr.mxu0 %v2362_v18 }
 0x13d   : > { %v443_v30 = vpop.f32.mrf.mxu0  ;;  %v2561_v33 = vpop.f32.mrf.mxu1 }
 0x13e   : > { %1946 = vmatmul.mubr.msk.f32.vlgmr.msra.gmra.mxu0 %vm523_vm1, %v438_v27  ;;  %501 = vrot.lane.b32.xlu1 %v440_v28, %s2366_s5  ;;  %v1041_v45 = vpack.c.bf16 %v2561_v33, %v2561_v33 }
 0x13f   : > { %486 = vrot.lane.b32.xlu0 %v438_v27, %s2365_s23  ;;  %1955 = vmatprep.mubr.msk.f32.mxu0 %vm2363_vm0, %v2362_v18  ;;  %v1941_v34 = vpop.f32.mrf.mxu1 }
 0x140   : > { %v1052_v46 = vsel %vm1050_vm2, %v1041_v45, 0 }
 0x141   : > { %v482_v37 = vpop.f32.mrf.mxu1 }
 0x142   : > { %490 = vrot.lane.b32.xlu1 %v438_v27, %s2366_s5 }
 0x143   : > { %488 = vrot.lane.b32.xlu0 %v438_v27, %s2364_s21  ;;  %v1942_v38 = vpop.f32.mrf.mxu1 }
 0x146   : > { %505 = vrot.lane.b32.xlu1 %v440_v28, %s2367_s7 }
 0x147   : > { %503 = vrot.lane.b32.xlu0 %v440_v28, %s2368_s8 }
 0x14a   : > { %494 = vrot.lane.b32.xlu1 %v438_v27, %s2367_s7 }
 0x14b   : > { %492 = vrot.lane.b32.xlu0 %v438_v27, %s2368_s8 }
 0x1ac   : > { %v500_v31 = vpop.permute.xlu1 %499  ;;  %v498_v32 = vpop.permute.xlu0 %497 }
 0x1ad   : > { %1949 = vmatpush3.xpose.msk.msra.mxu1 %vm523_vm1, %v498_v32  ;;  %1954 = vmatpush3.xpose.msk.msra.mxu0 %vm523_vm1, %v500_v31 }
 0x1ae   : > { %1958 = vmatprep.subr.mxu1 %v2362_v18  ;;  %1963 = vmatprep.subr.mxu0 %v2362_v18 }
 0x1b0   : > { %v502_v35 = vpop.permute.xlu1 %501 }
 0x1b1   : > { %v487_v36 = vpop.permute.xlu0 %486 }
 0x1b2   : > { %1951 = vmatmul.mubr.msk.f32.vlgmr.msra.gmra.mxu1 %vm523_vm1, %v487_v36 }
 0x1b3   : > { %1959 = vmatpush3.xpose.msk.msra.mxu1 %vm523_vm1, %v502_v35  ;;  %1960 = vmatprep.mubr.msk.f32.mxu1 %vm2363_vm0, %v2362_v18 }
 0x1b4   : > { %v491_v39 = vpop.permute.xlu1 %490  ;;  %1968 = vmatprep.subr.mxu1 %v2362_v18 }
 0x1b5   : > { %v489_v40 = vpop.permute.xlu0 %488 }
 0x1b6   : > { %1956 = vmatmul.mubr.msk.f32.vlgmr.msra.gmra.mxu0 %vm523_vm1, %v489_v40  ;;  %1961 = vmatmul.mubr.msk.f32.vlgmr.msra.gmra.mxu1 %vm523_vm1, %v491_v39 }
 0x1b7   : > { %1970 = vmatprep.mubr.msk.f32.mxu1 %vm2363_vm0, %v2362_v18  ;;  %1965 = vmatprep.mubr.msk.f32.mxu0 %vm2363_vm0, %v2362_v18 }
 0x1b8   : > { %v506_v41 = vpop.permute.xlu1 %505 }
 0x1b9   : > { %v504_v42 = vpop.permute.xlu0 %503  ;;  %1969 = vmatpush3.xpose.msk.msra.mxu1 %vm523_vm1, %v506_v41 }
 0x1ba   : > { %1964 = vmatpush3.xpose.msk.msra.mxu0 %vm523_vm1, %v504_v42  ;;  %1979 = vmatprep.subr.bf16.mxu1 %v2362_v18 }
 0x1bb   : > { %1973 = vmatprep.subr.bf16.mxu0 %v2362_v18 }
 0x1bc   : > { %v495_v43 = vpop.permute.xlu1 %494 }
 0x1bd   : > { %v493_v44 = vpop.permute.xlu0 %492  ;;  %1971 = vmatmul.mubr.msk.f32.vlgmr.msra.gmra.mxu1 %vm523_vm1, %v495_v43 }
 0x1be   : > { %1966 = vmatmul.mubr.msk.f32.vlgmr.msra.gmra.mxu0 %vm523_vm1, %v493_v44  ;;  %1981 = vmatprep.mubr.msk.bf16.mxu1 %vm2363_vm0, %v2362_v18 }
 0x1bf   : > { %1975 = vmatprep.mubr.msk.bf16.mxu0 %vm2363_vm0, %v2362_v18  ;;  %1974 = vmatpush3.bf16.msra.mxu0 %v1052_v46 }
 0x1c0   : > { %1985 = vmatprep.subr.bf16.mxu0 %v2362_v18 }
 0x1fe   : > { %v594_v47 = vpop.f32.mrf.mxu0 }
 0x1ff   : > { %v969_v48 = vsel %vm968_vm3, %v594_v47, -inf }
 0x200   : > { %970 = vmax.xlane.f32.xlu0 %v969_v48  ;;  %v1947_v49 = vpop.f32.mrf.mxu0 }
 0x272   : > { %v668_v50 = vpop.f32.mrf.mxu1 }
 0x273   : > { %v972_v51 = vsel %vm968_vm3, %v668_v50, -inf }
 0x274   : > { %973 = vmax.xlane.f32.xlu1 %v972_v51  ;;  %v1952_v52 = vpop.f32.mrf.mxu1 }
 0x276   : > { %v742_v53 = vpop.f32.mrf.mxu0  ;;  %v816_v54 = vpop.f32.mrf.mxu1 }
 0x277   : > { %v975_v55 = vsel %vm968_vm3, %v742_v53, -inf  ;;  %v978_v58 = vsel %vm968_vm3, %v816_v54, -inf }
 0x278   : > { %v1962_v56 = vpop.f32.mrf.mxu1  ;;  %976 = vmax.xlane.f32.xlu0 %v975_v55  ;;  %v1957_v57 = vpop.f32.mrf.mxu0 }
 0x279   : > { %v2170_v57 = vld [vmem:[#allocation7 + $0x14] ss:$0 sps:$4 sm:$0x33]  }
 0x27c   : > { %979 = vmax.xlane.f32.xlu0 %v978_v58 }
 0x27d   : > { %v964_v59 = vpop.f32.mrf.mxu1 }
 0x27e   : > { %v890_v60 = vpop.f32.mrf.mxu0  ;;  %v984_v61 = vsel %vm968_vm3, %v964_v59, -inf }
 0x27f   : > { %v1972_v62 = vpop.f32.mrf.mxu1  ;;  %v981_v63 = vsel %vm968_vm3, %v890_v60, -inf }
 0x280   : > { %985 = vmax.xlane.f32.xlu0 %v984_v61  ;;  %982 = vmax.xlane.f32.xlu1 %v981_v63  ;;  %v1967_v0 = vpop.f32.mrf.mxu0  ;;  %v1358_v61 = vsel %vm1356_vm4, %v2170_v57, 0 }
 0x289   : > { %v971_v1 = vpop.xlane.xlu0 %970 }
 0x28a   : > { %v987_v2 = vsub.f32 %v594_v47, %v971_v1 }
 0x28c   : > { %v993_v3 = vmul.f32 1.442695, %v987_v2 }
 0x28e   : > { %2180 = vpow2.f32 %v993_v3 }
 0x291   : > { %508 = vrot.lane.b32.xlu1 %v2561_v33, %s2365_s23 }
 0x29b   : > { %v2181_v4 = vpop.eup %2180 }
 0x29c   : > { %v1005_v5 = vsel %vm968_vm3, %v2181_v4, 0.0 }
 0x2b5   : > { %1006 = vadd.xlane.f32.xlu1 %v1005_v5 }
 0x2c6   : > { %514 = vrot.lane.b32.xlu1 %v2561_v33, %s2366_s5 }
 0x2fd   : > { %v974_v6 = vpop.xlane.xlu1 %973 }
 0x2fe   : > { %v988_v7 = vsub.f32 %v668_v50, %v974_v6 }
 0x300   : > { %v995_v8 = vmul.f32 1.442695, %v988_v7 }
 0x301   : > { %v977_v9 = vpop.xlane.xlu0 %976 }
 0x302   : > { %2182 = vpow2.f32 %v995_v8  ;;  %v989_v10 = vsub.f32 %v742_v53, %v977_v9  ;;  %v2168_v8 = vld [vmem:[#allocation7 + $0x8] ss:$0 sps:$4 sm:$0x33]  }
 0x304   : > { %v997_v11 = vmul.f32 1.442695, %v989_v10  ;;  %v1413_v10 = vsel %vm1356_vm4, %v2168_v8, 0 }
 0x305   : > { %v980_v25 = vpop.xlane.xlu0 %979 }
 0x306   : > { %2184 = vpow2.f32 %v997_v11  ;;  %v990_v26 = vsub.f32 %v816_v54, %v980_v25  ;;  %v2169_v11 = vld [vmem:[#allocation7] sm:$0xff]  }
 0x308   : > { %v999_v28 = vmul.f32 1.442695, %v990_v26 }
 0x309   : > { %v983_v12 = vpop.xlane.xlu1 %982  ;;  %v986_v27 = vpop.xlane.xlu0 %985 }
 0x30a   : > { %v991_v13 = vsub.f32 %v890_v60, %v983_v12  ;;  %v992_v29 = vsub.f32 %v964_v59, %v986_v27  ;;  %v2171_v12 = vld [vmem:[#allocation7 + $0xc] sm:$0xff]  }
 0x30c   : > { %v1001_v14 = vmul.f32 1.442695, %v991_v13  ;;  %v1003_v30 = vmul.f32 1.442695, %v992_v29  ;;  %v2173_v29 = vld [vmem:[#allocation7 + $0x18] sm:$0xff]  }
 0x30d   : > { %v509_v15 = vpop.permute.xlu1 %508  ;;  %v2176_v13 = vld [vmem:[#allocation7 + $0x2c] ss:$0 sps:$4 sm:$0x33]  }
 0x30e   : > { %v1042_v16 = vpack.c.bf16 %v509_v15, %v509_v15  ;;  %2186 = vpow2.f32 %v1001_v14 }
 0x30f   : > { %v2183_v17 = vpop.eup %2182  ;;  %2188 = vpow2.f32 %v999_v28 }
 0x310   : > { %v1098_v19 = vsel %vm1050_vm2, %v1042_v16, 0  ;;  %v1008_v20 = vsel %vm968_vm3, %v2183_v17, 0.0  ;;  %2190 = vpow2.f32 %v1003_v30  ;;  %v1526_v16 = vsel %vm1356_vm4, %v2176_v13, 0  ;;  %v2174_v30 = vld [vmem:[#allocation7 + $0x38] ss:$0 sps:$4 sm:$0x33]  }
 0x311   : > { %1009 = vadd.xlane.f32.xlu0 %v1008_v20  ;;  %1980 = vmatpush3.bf16.msra.mxu1 %v1098_v19 }
 0x312   : > { %1991 = vmatprep.subr.bf16.mxu1 %v2362_v18 }
 0x313   : > { %v2185_v21 = vpop.eup %2184 }
 0x314   : > { %v1011_v22 = vsel %vm968_vm3, %v2185_v21, 0.0 }
 0x315   : > { %1012 = vadd.xlane.f32.xlu1 %v1011_v22  ;;  %v2172_v22 = vld [vmem:[#allocation7 + $0x20] ss:$0 sps:$4 sm:$0x33]  }
 0x316   : > { %v1469_v25 = vsel %vm1356_vm4, %v2172_v22, 0 }
 0x31b   : > { %v2187_v23 = vpop.eup %2186 }
 0x31c   : > { %v1017_v24 = vsel %vm968_vm3, %v2187_v23, 0.0  ;;  %v2189_v32 = vpop.eup %2188 }
 0x31d   : > { %1018 = vadd.xlane.f32.xlu1 %v1017_v24  ;;  %v1014_v34 = vsel %vm968_vm3, %v2189_v32, 0.0  ;;  %v2611_v35 = vpop.eup %2190 }
 0x31e   : > { %v1020_v36 = vsel %vm968_vm3, %v2611_v35, 0.0 }
 0x327   : > { %511 = vrot.lane.b32.xlu0 %v2561_v33, %s2364_s21  ;;  %s2288_s21 = sshll.u32 %s2369_s12, 4  ;;  %s2289_s21 = int_to_ptr.vmem [resolvable:$false] %s2288_s21 }
 0x328   : > { %s2290_s23 = scalar_lea.vmem %s2289_s21, 256  ;;  %p2291_p6 = scmp.lt.s32.totalorder %s2684_s26, %s2289_s21 }
 0x329   : > { %p2292_p12 = scmp.lt.s32.totalorder %s2290_s23, %s2284_s19 }
 0x32b   : > { %p2293_p3 = por %p2292_p12, %p2291_p6 }
 0x32d   : > { %p2294_p9 = pnand %p2293_p3, %p2287_p2 }
 0x32e   : > { %517 = vrot.lane.b32.xlu1 %v2561_v33, %s2368_s8 }
 0x33e   : > { %v1007_v31 = vpop.xlane.xlu1 %1006 }
 0x33f   : > { %2192 = vrcp.f32 %v1007_v31 }
 0x342   : > { %v515_v40 = vpop.permute.xlu1 %514 }
 0x343   : > { %v1044_v48 = vpack.c.bf16 %v515_v40, %v515_v40 }
 0x345   : > { %v1190_v52 = vsel %vm1050_vm2, %v1044_v48, 0 }
 0x346   : > { %1015 = vadd.xlane.f32.xlu0 %v1014_v34 }
 0x34a   : > { %1021 = vadd.xlane.f32.xlu0 %v1020_v36  ;;  %v1583_v36 = vsel %vm1356_vm4, %v2174_v30, 0 }
 0x34c   : > { %v2193_v37 = vpop.eup %2192 }
 0x34d   : > { %v1029_v38 = vmul.f32 %v2193_v37, %v2181_v4 }
 0x34f   : > { %v1035_v39 = vpack.c.bf16 %v1029_v38, %v1029_v38  ;;  %v2175_v38 = vld [vmem:[#allocation7 + $0x30] sm:$0xff]  }
 0x351   : > { %1976 = vmatmul.mubr.msk.bf16.vlgmr.msra.gmra.mxu0 %vm968_vm3, %v1035_v39 }
 0x352   : > { %1987 = vmatprep.mubr.msk.bf16.mxu0 %vm2363_vm0, %v2362_v18 }
 0x360   : > { %520 = vrot.lane.b32.xlu0 %v2561_v33, %s2367_s7 }
 0x39a   : > { %v1010_v41 = vpop.xlane.xlu0 %1009 }
 0x39b   : > { %2194 = vrcp.f32 %v1010_v41 }
 0x39e   : > { %v512_v42 = vpop.permute.xlu0 %511  ;;  %v1013_v43 = vpop.xlane.xlu1 %1012 }
 0x39f   : > { %v1043_v44 = vpack.c.bf16 %v512_v42, %v512_v42  ;;  %2196 = vrcp.f32 %v1013_v43 }
 0x3a1   : > { %v1144_v45 = vsel %vm1050_vm2, %v1043_v44, 0  ;;  %v2178_v44 = vld [vmem:[#allocation7 + $0x44] ss:$0 sps:$4 sm:$0x33]  }
 0x3a2   : > { %1986 = vmatpush3.bf16.msra.mxu0 %v1144_v45 }
 0x3a3   : > { %1997 = vmatprep.subr.bf16.mxu0 %v2362_v18 }
 0x3a6   : > { %v1019_v46 = vpop.xlane.xlu1 %1018 }
 0x3a7   : > { %2198 = vrcp.f32 %v1019_v46 }
 0x3a8   : > { %v2195_v47 = vpop.eup %2194 }
 0x3a9   : > { %v1030_v49 = vmul.f32 %v2195_v47, %v2183_v17  ;;  %v1640_v47 = vsel %vm1356_vm4, %v2178_v44, 0 }
 0x3aa   : > { %v518_v50 = vpop.permute.xlu1 %517 }
 0x3ab   : > { %v1036_v51 = vpack.c.bf16 %v1030_v49, %v1030_v49  ;;  %v1045_v53 = vpack.c.bf16 %v518_v50, %v518_v50  ;;  %v2179_v50 = vld [vmem:[#allocation7 + $0x3c] sm:$0xff]  }
 0x3ac   : > { %v2197_v33 = vpop.eup %2196 }
 0x3ad   : > { %1982 = vmatmul.mubr.msk.bf16.vlgmr.msra.gmra.mxu1 %vm968_vm3, %v1036_v51  ;;  %v1031_v54 = vmul.f32 %v2197_v33, %v2185_v21  ;;  %v1236_v56 = vsel %vm1050_vm2, %v1045_v53, 0  ;;  %v2177_v21 = vld [vmem:[#allocation7 + $0x24] sm:$0xff]  }
 0x3ae   : > { %1992 = vmatpush3.bf16.msra.mxu1 %v1190_v52  ;;  %1993 = vmatprep.mubr.msk.bf16.mxu1 %vm2363_vm0, %v2362_v18 }
 0x3af   : > { %v1037_v55 = vpack.c.bf16 %v1031_v54, %v1031_v54  ;;  %2003 = vmatprep.subr.bf16.mxu1 %v2362_v18 }
 0x3b1   : > { %1988 = vmatmul.mubr.msk.bf16.vlgmr.msra.gmra.mxu0 %vm968_vm3, %v1037_v55 }
 0x3b2   : > { %1998 = vmatpush3.bf16.msra.mxu0 %v1236_v56  ;;  %1999 = vmatprep.mubr.msk.bf16.mxu0 %vm2363_vm0, %v2362_v18 }
 0x3b3   : > { %2009 = vmatprep.subr.bf16.mxu0 %v2362_v18 }
 0x3b4   : > { %v2199_v58 = vpop.eup %2198 }
 0x3b5   : > { %v1033_v59 = vmul.f32 %v2199_v58, %v2187_v23 }
 0x3b7   : > { %v1039_v60 = vpack.c.bf16 %v1033_v59, %v1033_v59 }
 0x3b9   : > { %2000 = vmatmul.mubr.msk.bf16.vlgmr.msra.gmra.mxu0 %vm968_vm3, %v1039_v60 }
 0x3ba   : > { %2010 = vmatpush3.bf16.msra.mxu0 %v1358_v61  ;;  %2013 = vmatprep.mubr.msk.bf16.mxu0 %vm2363_vm0, %v2362_v18 }
 0x3bb   : > { %2011 = vmatprep.subr.bf16.mxu0 %v2362_v18 }
 0x3be   : > { %2012 = vmatpush3.bf16.msra.mxu0 %v2171_v12 }
 0x3bf   : > { %2025 = vmatprep.subr.bf16.mxu0 %v2362_v18 }
 0x3cf   : > { %v1016_v62 = vpop.xlane.xlu0 %1015 }
 0x3d0   : > { %2200 = vrcp.f32 %v1016_v62 }
 0x3d3   : > { %v1022_v63 = vpop.xlane.xlu0 %1021 }
 0x3d4   : > { %2202 = vrcp.f32 %v1022_v63 }
 0x3d7   : > { %v521_v0 = vpop.permute.xlu0 %520 }
 0x3d8   : > { %v1046_v2 = vpack.c.bf16 %v521_v0, %v521_v0 }
 0x3da   : > { %v1282_v6 = vsel %vm1050_vm2, %v1046_v2, 0 }
 0x3dd   : > { %v2201_v1 = vpop.eup %2200 }
 0x3de   : > { %v1032_v3 = vmul.f32 %v2201_v1, %v2189_v32 }
 0x3e0   : > { %v1038_v4 = vpack.c.bf16 %v1032_v3, %v1032_v3 }
 0x3e1   : > { %v2203_v5 = vpop.eup %2202 }
 0x3e2   : > { %1994 = vmatmul.mubr.msk.bf16.vlgmr.msra.gmra.mxu1 %vm968_vm3, %v1038_v4  ;;  %v1034_v7 = vmul.f32 %v2203_v5, %v2611_v35 }
 0x3e3   : > { %2004 = vmatpush3.bf16.msra.mxu1 %v1282_v6  ;;  %2005 = vmatprep.mubr.msk.bf16.mxu1 %vm2363_vm0, %v2362_v18 }
 0x3e4   : > { %2017 = vmatprep.subr.bf16.mxu1 %v2362_v18  ;;  %v1040_v9 = vpack.c.bf16 %v1034_v7, %v1034_v7 }
 0x3ea   : > { %2006 = vmatmul.mubr.msk.bf16.vlgmr.msra.gmra.mxu1 %vm968_vm3, %v1040_v9 }
 0x3eb   : > { %2018 = vmatpush3.bf16.msra.mxu1 %v1413_v10  ;;  %2021 = vmatprep.mubr.msk.bf16.mxu1 %vm2363_vm0, %v2362_v18 }
 0x3ec   : > { %2019 = vmatprep.subr.bf16.mxu1 %v2362_v18 }
 0x3ef   : > { %2020 = vmatpush3.bf16.msra.mxu1 %v2169_v11 }
 0x3f0   : > { %2033 = vmatprep.subr.bf16.mxu1 %v2362_v18 }
 0x411   : > { %v1088_v14 = vpop.f32.mrf.mxu0 }
 0x412   : > { %v1342_v15 = vpack.c.bf16 %v1088_v14, %v1088_v14 }
 0x413   : > { %v1977_v17 = vpop.f32.mrf.mxu0 }
 0x414   : > { %2022 = vmatmul.mubr.msk.bf16.vlgmr.msra.gmra.mxu1 %vm523_vm1, %v1342_v15 }
 0x415   : > { %v1091_v19 = vpop.f32.mrf.mxu0  ;;  %2034 = vmatpush3.bf16.msra.mxu1 %v1526_v16  ;;  %2037 = vmatprep.mubr.msk.bf16.mxu1 %vm2363_vm0, %v2362_v18  ;;  %v1867_v16 = vld [vmem:[%s2728_s3] ss:$0 sm:$0xff] }
 0x416   : > { %2035 = vmatprep.subr.bf16.mxu1 %v2362_v18 }
 0x417   : > { %v1978_v20 = vpop.f32.mrf.mxu0 }
 0x419   : > { %2036 = vmatpush3.bf16.msra.mxu1 %v2177_v21 }
 0x41a   : > { %2049 = vmatprep.subr.bf16.mxu1 %v2362_v18 }
 0x46d   : > { %v1134_v23 = vpop.f32.mrf.mxu1 }
 0x46e   : > { %v1343_v24 = vpack.c.bf16 %v1134_v23, %v1134_v23 }
 0x46f   : > { %v1983_v26 = vpop.f32.mrf.mxu1 }
 0x470   : > { %2014 = vmatmul.mubr.msk.bf16.vlgmr.msra.gmra.mxu0 %vm523_vm1, %v1343_v24 }
 0x471   : > { %v1137_v27 = vpop.f32.mrf.mxu1  ;;  %v1180_v28 = vpop.f32.mrf.mxu0  ;;  %2026 = vmatpush3.bf16.msra.mxu0 %v1469_v25  ;;  %2029 = vmatprep.mubr.msk.bf16.mxu0 %vm2363_vm0, %v2362_v18 }
 0x472   : > { %2027 = vmatprep.subr.bf16.mxu0 %v2362_v18  ;;  %v1455_v35 = vpack.c.bf16 %v1180_v28, %v1180_v28 }
 0x473   : > { %v1984_v31 = vpop.f32.mrf.mxu1  ;;  %v1989_v32 = vpop.f32.mrf.mxu0 }
 0x475   : > { %v1183_v34 = vpop.f32.mrf.mxu0  ;;  %2028 = vmatpush3.bf16.msra.mxu0 %v2173_v29 }
 0x476   : > { %2041 = vmatprep.subr.bf16.mxu0 %v2362_v18 }
 0x477   : > { %v1990_v37 = vpop.f32.mrf.mxu0 }
 0x478   : > { %2030 = vmatmul.mubr.msk.bf16.vlgmr.msra.gmra.mxu0 %vm523_vm1, %v1455_v35 }
 0x479   : > { %2042 = vmatpush3.bf16.msra.mxu0 %v1583_v36  ;;  %2045 = vmatprep.mubr.msk.bf16.mxu0 %vm2363_vm0, %v2362_v18  ;;  %v1272_v39 = vpop.f32.mrf.mxu0 }
 0x47a   : > { %2043 = vmatprep.subr.bf16.mxu0 %v2362_v18  ;;  %v1569_v41 = vpack.c.bf16 %v1272_v39, %v1272_v39 }
 0x47b   : > { %v2001_v40 = vpop.f32.mrf.mxu0 }
 0x47d   : > { %2044 = vmatpush3.bf16.msra.mxu0 %v2175_v38  ;;  %v1275_v42 = vpop.f32.mrf.mxu0 }
 0x47f   : > { %v2002_v43 = vpop.f32.mrf.mxu0 }
 0x480   : > { %2046 = vmatmul.mubr.msk.bf16.vlgmr.msra.gmra.mxu0 %vm523_vm1, %v1569_v41 }
 0x4a2   : > { %v1226_v45 = vpop.f32.mrf.mxu1 }
 0x4a3   : > { %v1512_v46 = vpack.c.bf16 %v1226_v45, %v1226_v45 }
 0x4a4   : > { %v1995_v48 = vpop.f32.mrf.mxu1 }
 0x4a5   : > { %2038 = vmatmul.mubr.msk.bf16.vlgmr.msra.gmra.mxu1 %vm523_vm1, %v1512_v46 }
 0x4a6   : > { %v1229_v49 = vpop.f32.mrf.mxu1  ;;  %2050 = vmatpush3.bf16.msra.mxu1 %v1640_v47  ;;  %2053 = vmatprep.mubr.msk.bf16.mxu1 %vm2363_vm0, %v2362_v18 }
 0x4a7   : > { %2051 = vmatprep.subr.bf16.mxu1 %v2362_v18 }
 0x4a8   : > { %v1996_v51 = vpop.f32.mrf.mxu1 }
 0x4aa   : > { %v1318_v33 = vpop.f32.mrf.mxu1  ;;  %2052 = vmatpush3.bf16.msra.mxu1 %v2179_v50 }
 0x4ab   : > { %v1626_v52 = vpack.c.bf16 %v1318_v33, %v1318_v33 }
 0x4ac   : > { %v2007_v53 = vpop.f32.mrf.mxu1 }
 0x4ad   : > { %2054 = vmatmul.mubr.msk.bf16.vlgmr.msra.gmra.mxu1 %vm523_vm1, %v1626_v52 }
 0x4ae   : > { %v1321_v54 = vpop.f32.mrf.mxu1 }
 0x4b0   : > { %v2008_v55 = vpop.f32.mrf.mxu1 }
 0x4d4   : > { %v1449_v56 = vpop.f32.mrf.mxu1 }
 0x4d6   : > { %v2023_v57 = vpop.f32.mrf.mxu1 }
 0x4d8   : > { %v1452_v58 = vpop.f32.mrf.mxu1 }
 0x4da   : > { %v2024_v59 = vpop.f32.mrf.mxu1 }
 0x530   : > { %v1394_v60 = vpop.f32.mrf.mxu0 }
 0x531   : > { %v1450_v7 = vadd.f32 %v1449_v56, %v1394_v60 }
 0x532   : > { %v2015_v61 = vpop.f32.mrf.mxu0 }
 0x534   : > { %v1397_v62 = vpop.f32.mrf.mxu0 }
 0x536   : > { %v2016_v63 = vpop.f32.mrf.mxu0 }
 0x538   : > { %v1505_v0 = vpop.f32.mrf.mxu0 }
 0x539   : > { %v1511_v9 = vadd.f32 %v1505_v0, %v1450_v7 }
 0x53a   : > { %v2031_v18 = vpop.f32.mrf.mxu0 }
 0x53c   : > { %v1508_v1 = vpop.f32.mrf.mxu0 }
 0x53e   : > { %v2032_v2 = vpop.f32.mrf.mxu0 }
 0x540   : > { %v1619_v3 = vpop.f32.mrf.mxu0 }
 0x542   : > { %v2047_v4 = vpop.f32.mrf.mxu0 }
 0x544   : > { %v1622_v5 = vpop.f32.mrf.mxu0 }
 0x546   : > { %v2048_v6 = vpop.f32.mrf.mxu0 }
 0x565   : > { %v1562_v8 = vpop.f32.mrf.mxu1 }
 0x566   : > { %v1568_v11 = vadd.f32 %v1562_v8, %v1511_v9 }
 0x567   : > { %v2039_v10 = vpop.f32.mrf.mxu1 }
 0x568   : > { %v1625_v14 = vadd.f32 %v1619_v3, %v1568_v11 }
 0x569   : > { %v1565_v12 = vpop.f32.mrf.mxu1 }
 0x56b   : > { %v2040_v13 = vpop.f32.mrf.mxu1 }
 0x56d   : > { %v1676_v15 = vpop.f32.mrf.mxu1 }
 0x56e   : > { %v1682_v17 = vadd.f32 %v1676_v15, %v1625_v14 }
 0x56f   : > { %v2055_v19 = vpop.f32.mrf.mxu1 }
 0x570   : > { %v1690_v20 = vadd.f32 %v1867_v16, %v1682_v17 }
 0x571   : > { %v1679_v21 = vpop.f32.mrf.mxu1 }
 0x572   : > { %1691 = vst [vmem:[%s241_s28] sm:$0xff] %v1690_v20 }
 0x573   : > { %v2056_v22 = vpop.f32.mrf.mxu1 }
 0x574   : > { %2297 = shalt.err (!%p2294_p9)
}
 0x575   : > { %s2298_s5 = scalar_lea.hbm %s2682_s10, 128  ;;  %s2302_s8 = scalar_lea.hbm %s2729_s4, 256 }
 0x576   : > { %p2299_p13 = scmp.ne.s32.totalorder %s2682_s10, %s2298_s5  ;;  %p2303_p0 = scmp.lt.s32.totalorder %s2682_s10, %s2729_s4 }
 0x577   : > { %p2304_p4 = scmp.lt.s32.totalorder %s2302_s8, %s2298_s5 }
 0x578   : > { %p2300_p5 = pnand %p2299_p13, %p2745_p11 }
 0x579   : > { %p2305_p8 = por %p2304_p4, %p2303_p0 }
 0x57a   : > { %p2301_p10 = pneg %p2300_p5 }
 0x57c   : > { %p2306_p7 = pnand %p2305_p8, %p2301_p10 }
 0x57e   : > { %2309 = shalt.err (!%p2306_p7)
}
 0x57f   : > { %2067 = dma.vmem_to_hbm [thread:$0]  (%p2745_p11), %s2684_s26, 128, %s2682_s10, %s1693_s11  }
 0x580 PF: > { %s1718_s20 = sand.u32 1, %s2340_s15   ;;  %p2746_p1 = scmp.ne.s32.totalorder %s2735_s22, 0 }
 0x581   : > { %p2747_p2 = scmp.ge.s32.totalorder %s2352_s18, 2  ;;  %s1719_s27 = scalar_lea.sflag [#allocation4], %s1718_s20 }
 0x583   : > { %p2081_p6 = pnand %p2747_p2, %p2746_p1 }
 0x585   : > { %p2082_p12 = pneg %p2081_p6 }
 0x587   : > { %2335 = dma.done.wait (%p2082_p12), %s1719_s27, 128  }
 0x588   : > { %2337 = vsyncadd (%p2082_p12), %s1719_s27, 4294967168  ;;  %p18_p3 = scmp.ge.s32.totalorder %s2467_s13, 4   ;;  %s2748_s15 = smov %s2344_s16 }
 0x589   : > { %s2749_s16 = smov %s2348_s17  ;;  %s2750_s17 = smov %s2476_s24 }
 0x58a   : > { %s2751_s18 = smov %s2467_s13  ;;  %20 = sbr.rel (!%p18_p3) target bundleno = 6 (0x6), region = 89 }
 0x58f   :  { %1724 = vsyncpa [#allocation3], 1 }
 0x590   :  { %1726 = vsyncpa [#allocation3 + $0x1], 1 }
 0x591   :  { %1727 = vsyncpa [#allocation6], 1 }
 0x592   :  { %1728 = vsyncpa [#allocation4], 1 }
 0x593   :  { %1730 = vsyncpa [#allocation4 + $0x1], 1 }

</bundles_post_ra>
